<compile_context>
chip_gen: v5e
topology: v5e:2x2
jax: 0.10.0
libtpu: 0.0.40
codegen_flags: <defaults>
</compile_context>

<pallas_src>
import functools

import jax
import jax.numpy as jnp
from jax.experimental import pallas as pl
from jax.experimental.pallas import tpu as pltpu


def _round_up(x, m):
    return (x + m - 1) // m * m


def _pick_tiles(n_pad):
    """Pick (block_m, block_k) that divide n_pad (a multiple of 128).

    Prefer big row tiles (block_m) -- they cut the h_kv HBM re-read traffic by
    n_pad/block_m and amortize the ~0.35us per-grid-step overhead -- but keep
    >=2 row tiles when possible so the 'parallel' row axis can be split across
    v7x's two TensorCores, and never introduce padding beyond the 128 round-up
    (avoids the small-N regression of a fixed 512 tile).
    """
    block_m = 128
    for cand in (512, 384, 256, 128):
        if n_pad % cand == 0 and n_pad // cand >= (2 if n_pad >= 256 else 1):
            block_m = cand
            break
    # K=256 matches the 256-wide MXU contraction on v6e/v7x and halves the
    # number of online-softmax correction passes; v5e's 128-wide MXU is already
    # full at K=128 and is MXU/HBM-bound there, so 256 does not hurt it.
    block_k = 256 if (block_m % 256 == 0) else 128
    return block_m, block_k


# ---------------------------------------------------------------------------
# Kernel 1: projection.  h = x @ W ;  f1 = (h*a1).sum(-1) col ; f2 row.
# ---------------------------------------------------------------------------
def _proj_kernel(x_ref, w_ref, a1_ref, a2_ref, h_ref, f1_ref, f2_ref):
    # MXU matmul, f32 accumulate (x/W may already be bf16 from the wrapper).
    h = jnp.dot(x_ref[...], w_ref[...], preferred_element_type=jnp.float32)
    # Attention projections on the VPU/XLU from the f32 result, *before* the
    # (optional) bf16 downcast of h.  A (f,1)-wide MXU matmul would waste all
    # but one MXU output column.
    f1 = jnp.sum(h * a1_ref[...], axis=-1, keepdims=True)        # (tm, 1)
    f2 = jnp.sum(h * a2_ref[...], axis=-1, keepdims=True)        # (tm, 1)
    h_ref[...] = h.astype(h_ref.dtype)                           # f32 or bf16
    f1_ref[...] = f1                                             # (tm, 1) column
    f2_ref[...] = f2.T                                           # (1, tm) lane-oriented


# ---------------------------------------------------------------------------
# Kernel 2: masked additive attention + online softmax + aggregation.
# ---------------------------------------------------------------------------
def _attn_kernel(f1_ref, f2_ref, hkv_ref, adj_ref, out_ref,
                 m_sc, l_sc, acc_sc, *, alpha, concat, use_bf16):
    kv = pl.program_id(1)

    @pl.when(kv == 0)
    def _init():
        m_sc[...] = jnp.full_like(m_sc, -jnp.inf)
        l_sc[...] = jnp.zeros_like(l_sc)
        acc_sc[...] = jnp.zeros_like(acc_sc)

    # GAT additive logits: e[i,j] = leakyrelu(f1[i] + f2[j])      (tm, tk), VPU
    e = f1_ref[...] + f2_ref[...]
    e = jnp.maximum(e, alpha * e)                  # LeakyReLU (0 < alpha < 1), 1 VALU op
    e = jnp.where(adj_ref[...] > 0, e, jnp.float32(-9e15))        # adjacency mask

    # online-softmax update (statistics stay f32)
    m_prev = m_sc[...]
    m_new = jnp.maximum(m_prev, jnp.max(e, axis=-1, keepdims=True))
    corr = jnp.exp(m_prev - m_new)
    if use_bf16:
        # bf16 exponentials (v6e/v7x EUP); row sums / stats stay f32.
        p = jnp.exp((e - m_new).astype(jnp.bfloat16))             # (tm, tk) bf16
        p_sum = jnp.sum(p.astype(jnp.float32), axis=-1, keepdims=True)
    else:
        p = jnp.exp(e - m_new)                                    # (tm, tk) f32
        p_sum = jnp.sum(p, axis=-1, keepdims=True)
    l_sc[...] = corr * l_sc[...] + p_sum
    acc_sc[...] = corr * acc_sc[...] + jnp.dot(
        p, hkv_ref[...], preferred_element_type=jnp.float32)      # (tm, f_pad) MXU
    m_sc[...] = m_new

    @pl.when(kv == pl.num_programs(1) - 1)
    def _finalize():
        hp = acc_sc[...] * pl.reciprocal(l_sc[...], approx=True)
        if concat:
            # ELU: exp only on the (clamped) negative side -> no discarded infs.
            hp = jnp.where(hp > 0, hp, jnp.exp(jnp.minimum(hp, 0.0)) - 1.0)
        out_ref[...] = hp.astype(out_ref.dtype)


# ---------------------------------------------------------------------------
# Wrapper
# ---------------------------------------------------------------------------
def gat_layer(x, adj, W, a, *, alpha=0.2, concat=True, use_bf16=False,
              block_m=None, block_k=None):
    """GraphAttentionLayer.forward (inference mode) as Pallas TPU kernels."""
    N, f_in = x.shape
    f_out = W.shape[1]
    assert a.shape == (2 * f_out, 1)

    n_pad = _round_up(N, 128)
    auto_m, auto_k = _pick_tiles(n_pad)
    block_m = auto_m if block_m is None else block_m
    block_k = auto_k if block_k is None else block_k
    assert n_pad % block_m == 0 and n_pad % block_k == 0
    f_pad = _round_up(f_out, 128)          # lane-dense matmul outputs / stores

    in_dtype = jnp.bfloat16 if use_bf16 else jnp.float32
    h_dtype = jnp.bfloat16 if use_bf16 else jnp.float32
    h_bytes = 2 if use_bf16 else 4

    # Zero-padding keeps the math exact: padded W columns give zero h columns,
    # padded a entries give unchanged f1/f2, padded adj entries are masked.
    x_p = jnp.zeros((n_pad, f_in), in_dtype).at[:N].set(x.astype(in_dtype))
    w_p = jnp.zeros((f_in, f_pad), in_dtype).at[:, :f_out].set(W.astype(in_dtype))
    a1_row = jnp.zeros((1, f_pad), jnp.float32).at[0, :f_out].set(
        a[:f_out, 0].astype(jnp.float32))
    a2_row = jnp.zeros((1, f_pad), jnp.float32).at[0, :f_out].set(
        a[f_out:, 0].astype(jnp.float32))
    adj_p = jnp.zeros((n_pad, n_pad), jnp.int8).at[:N, :N].set(
        (adj > 0).astype(jnp.int8))

    # Tiles use ~2 MiB even at block_m=512; 48 MiB keeps headroom on every
    # generation (v7x physical VMEM is 64 MiB; v5e/v6e have 128 MiB).
    vmem_limit = 48 * 1024 * 1024

    # ---- 1) projection: h = x @ W, plus f1 / f2 projections (hoisted)
    h, f1_col, f2_row = pl.pallas_call(
        _proj_kernel,
        out_shape=(jax.ShapeDtypeStruct((n_pad, f_pad), h_dtype),
                   jax.ShapeDtypeStruct((n_pad, 1), jnp.float32),
                   jax.ShapeDtypeStruct((1, n_pad), jnp.float32)),
        grid_spec=pltpu.PrefetchScalarGridSpec(
            num_scalar_prefetch=0,
            grid=(n_pad // block_m,),
            in_specs=[pl.BlockSpec((block_m, f_in), lambda i: (i, 0)),
                      pl.BlockSpec((f_in, f_pad), lambda i: (0, 0)),
                      pl.BlockSpec((1, f_pad), lambda i: (0, 0)),
                      pl.BlockSpec((1, f_pad), lambda i: (0, 0))],
            out_specs=[pl.BlockSpec((block_m, f_pad), lambda i: (i, 0)),
                       pl.BlockSpec((block_m, 1), lambda i: (i, 0)),
                       pl.BlockSpec((1, block_m), lambda i: (0, i))]),
        compiler_params=pltpu.CompilerParams(
            dimension_semantics=("parallel",),
            vmem_limit_bytes=vmem_limit),
        cost_estimate=pl.CostEstimate(
            flops=2 * n_pad * f_in * f_pad + 4 * n_pad * f_pad,
            transcendentals=0,
            bytes_accessed=(h_bytes * (n_pad * f_in + f_in * f_pad)
                            + h_bytes * n_pad * f_pad + 4 * 2 * n_pad)),
    )(x_p, w_p, a1_row, a2_row)

    # ---- 2) attention: flash-style online softmax over kv tiles
    row_tiles = n_pad // block_m
    kv_tiles = n_pad // block_k
    out = pl.pallas_call(
        functools.partial(_attn_kernel, alpha=float(alpha), concat=bool(concat),
                          use_bf16=use_bf16),
        out_shape=jax.ShapeDtypeStruct((n_pad, f_pad), jnp.float32),
        grid_spec=pltpu.PrefetchScalarGridSpec(
            num_scalar_prefetch=0,
            grid=(row_tiles, kv_tiles),
            in_specs=[pl.BlockSpec((block_m, 1), lambda i, k: (i, 0)),        # f1 column
                      pl.BlockSpec((1, block_k), lambda i, k: (0, k)),        # f2 row slice
                      pl.BlockSpec((block_k, f_pad), lambda i, k: (k, 0)),    # h (kv rows)
                      pl.BlockSpec((block_m, block_k), lambda i, k: (i, k))], # adj (int8)
            out_specs=pl.BlockSpec((block_m, f_pad), lambda i, k: (i, 0)),
            scratch_shapes=[pltpu.VMEM((block_m, 1), jnp.float32),       # m
                            pltpu.VMEM((block_m, 1), jnp.float32),       # l
                            pltpu.VMEM((block_m, f_pad), jnp.float32)]), # acc
        compiler_params=pltpu.CompilerParams(
            dimension_semantics=("parallel", "arbitrary"),
            vmem_limit_bytes=vmem_limit),
        cost_estimate=pl.CostEstimate(
            flops=2 * n_pad * n_pad * f_pad + 10 * n_pad * n_pad,
            transcendentals=n_pad * n_pad + n_pad * kv_tiles + n_pad,
            bytes_accessed=(n_pad * n_pad                          # int8 adj
                            + h_bytes * n_pad * f_pad * row_tiles  # h kv re-reads
                            + 4 * 2 * n_pad                        # f1 + f2
                            + 4 * n_pad * f_pad)),                 # out
    )(f1_col, f2_row, h, adj_p)

    return out[:N, :f_out]


# ---------------------------------------------------------------------------
# Reference + self-test
# ---------------------------------------------------------------------------
def _xavier_uniform(key, shape, gain):
    fan_in, fan_out = shape
    bound = gain * jnp.sqrt(6.0 / (fan_in + fan_out))
    return jax.random.uniform(key, shape, jnp.float32, -bound, bound)


def _reference(x, adj, W, a, alpha, concat, use_bf16=False):
    """Pure-JAX mirror of the PyTorch forward (inference mode)."""
    f_out = W.shape[1]
    if use_bf16:
        h = jnp.dot(x.astype(jnp.bfloat16), W.astype(jnp.bfloat16),
                    preferred_element_type=jnp.float32)
    else:
        h = x @ W
    e = (h @ a[:f_out]) + (h @ a[f_out:]).T
    e = jnp.where(e > 0, e, alpha * e)
    e = jnp.where(adj > 0, e, -9e15)
    attn = jax.nn.softmax(e, axis=1)
    if use_bf16:
        hp = jnp.dot(attn.astype(jnp.bfloat16), h.astype(jnp.bfloat16),
                     preferred_element_type=jnp.float32)
    else:
        hp = attn @ h
    return jax.nn.elu(hp) if concat else hp


if __name__ == "__main__":
    key = jax.random.PRNGKey(0)
    k_x, k_adj, k_w, k_a, k_x2, k_adj2, k_w2, k_a2 = jax.random.split(key, 8)
    alpha = 0.2  # LeakyReLU negative slope; dropout unused in inference

    # --- test 1: tiny module-spec shapes, f32 matmuls, concat=True ---
    N, f_in, f_out = 8, 16, 32
    x = jax.random.normal(k_x, (N, f_in), jnp.float32)
    adj = (jax.random.uniform(k_adj, (N, N)) > 0.5).astype(jnp.float32)
    adj = jnp.maximum(adj, jnp.eye(N, dtype=jnp.float32))      # self-loops
    W = _xavier_uniform(k_w, (f_in, f_out), gain=1.414)
    a = _xavier_uniform(k_a, (2 * f_out, 1), gain=1.414)

    out = jax.block_until_ready(gat_layer(x, adj, W, a, alpha=alpha, concat=True))
    ref = _reference(x, adj, W, a, alpha, True)
    assert out.shape == (N, f_out)
    assert jnp.allclose(out, ref, atol=1e-2, rtol=1e-2), \
        f"f32 mismatch, max abs err {float(jnp.max(jnp.abs(out - ref)))}"

    # --- test 2: multi-tile grid, bf16 h storage / MXU / exp, concat=False ---
    N2, f_in2, f_out2 = 300, 48, 96
    x2 = jax.random.normal(k_x2, (N2, f_in2), jnp.float32)
    adj2 = (jax.random.uniform(k_adj2, (N2, N2)) > 0.9).astype(jnp.float32)
    adj2 = jnp.maximum(adj2, jnp.eye(N2, dtype=jnp.float32))
    W2 = _xavier_uniform(k_w2, (f_in2, f_out2), gain=1.414)
    a2 = _xavier_uniform(k_a2, (2 * f_out2, 1), gain=1.414)

    out2 = jax.block_until_ready(
        gat_layer(x2, adj2, W2, a2, alpha=alpha, concat=False, use_bf16=True))
    ref2 = _reference(x2, adj2, W2, a2, alpha, False, use_bf16=True)
    assert out2.shape == (N2, f_out2)
    assert jnp.allclose(out2, ref2, atol=5e-2, rtol=5e-2), \
        f"bf16 mismatch, max abs err {float(jnp.max(jnp.abs(out2 - ref2)))}"

    print("KERNEL_OK")
</pallas_src>

<mosaic_0001>
module attributes {stable_mosaic.version = 11 : i64} {
  func.func @_proj_kernel(%arg0: i32, %arg1: memref<128x16xf32, #tpu.memory_space<vmem>>, %arg2: memref<16x128xf32, #tpu.memory_space<vmem>>, %arg3: memref<1x128xf32, #tpu.memory_space<vmem>>, %arg4: memref<1x128xf32, #tpu.memory_space<vmem>>, %arg5: memref<128x128xf32, #tpu.memory_space<vmem>>, %arg6: memref<128x1xf32, #tpu.memory_space<vmem>>, %arg7: memref<1x128xf32, #tpu.memory_space<vmem>>) attributes {dimension_semantics = [#tpu.dimension_semantics<parallel>], iteration_bounds = array<i64: 1>, scalar_prefetch = 0 : i64, scratch_operands = 0 : i64, tpu.core_type = #tpu.core_type<tc>, window_params = [{transform_indices = @transform_0, window_bounds = array<i64: 128, 16>}, {pipeline_mode = #tpu.pipeline_mode<synchronous>, transform_indices = @transform_1, window_bounds = array<i64: 16, 128>}, {pipeline_mode = #tpu.pipeline_mode<synchronous>, transform_indices = @transform_2, window_bounds = array<i64: 1, 128>}, {pipeline_mode = #tpu.pipeline_mode<synchronous>, transform_indices = @transform_3, window_bounds = array<i64: 1, 128>}, {transform_indices = @transform_4, window_bounds = array<i64: 128, 128>}, {transform_indices = @transform_5, window_bounds = array<i64: 128, 1>}, {transform_indices = @transform_6, window_bounds = array<i64: 1, 128>}]} {
    %c0 = arith.constant 0 : index
    %c0_0 = arith.constant 0 : index
    %0 = vector.load %arg1[%c0, %c0_0] : memref<128x16xf32, #tpu.memory_space<vmem>>, vector<128x16xf32>
    %c0_1 = arith.constant 0 : index
    %c0_2 = arith.constant 0 : index
    %1 = vector.load %arg2[%c0_1, %c0_2] : memref<16x128xf32, #tpu.memory_space<vmem>>, vector<16x128xf32>
    %cst = arith.constant dense<0.000000e+00> : vector<128x128xf32>
    %2 = tpu.matmul %0, %1, %cst {dimension_numbers = #tpu.dot_dimension_numbers<[1], [0], [0], [1], [0, 0, 1, 1], [], []>} : vector<128x16xf32>, vector<16x128xf32>, vector<128x128xf32> -> vector<128x128xf32>
    %c0_3 = arith.constant 0 : index
    %c0_4 = arith.constant 0 : index
    %3 = vector.load %arg3[%c0_3, %c0_4] : memref<1x128xf32, #tpu.memory_space<vmem>>, vector<1x128xf32>
    %4 = vector.broadcast %3 : vector<1x128xf32> to vector<128x128xf32>
    %5 = arith.mulf %2, %4 : vector<128x128xf32>
    %cst_5 = arith.constant dense<0.000000e+00> : vector<128xf32>
    %6 = vector.multi_reduction <add>, %5, %cst_5 [1] : vector<128x128xf32> to vector<128xf32>
    %7 = vector.shape_cast %6 : vector<128xf32> to vector<128x1xf32>
    %c0_6 = arith.constant 0 : index
    %c0_7 = arith.constant 0 : index
    %8 = vector.load %arg4[%c0_6, %c0_7] : memref<1x128xf32, #tpu.memory_space<vmem>>, vector<1x128xf32>
    %9 = vector.broadcast %8 : vector<1x128xf32> to vector<128x128xf32>
    %10 = arith.mulf %2, %9 : vector<128x128xf32>
    %cst_8 = arith.constant dense<0.000000e+00> : vector<128xf32>
    %11 = vector.multi_reduction <add>, %10, %cst_8 [1] : vector<128x128xf32> to vector<128xf32>
    %12 = vector.shape_cast %11 : vector<128xf32> to vector<128x1xf32>
    %c0_9 = arith.constant 0 : index
    %c0_10 = arith.constant 0 : index
    %13 = vector.load %arg5[%c0_9, %c0_10] : memref<128x128xf32, #tpu.memory_space<vmem>>, vector<128x128xf32>
    tpu.vector_store %arg5[%c0_9, %c0_10], %2 {strides = array<i32>} : memref<128x128xf32, #tpu.memory_space<vmem>>, vector<128x128xf32>,
    %c0_11 = arith.constant 0 : index
    %c0_12 = arith.constant 0 : index
    %14 = vector.load %arg6[%c0_11, %c0_12] : memref<128x1xf32, #tpu.memory_space<vmem>>, vector<128x1xf32>
    tpu.vector_store %arg6[%c0_11, %c0_12], %7 {strides = array<i32>} : memref<128x1xf32, #tpu.memory_space<vmem>>, vector<128x1xf32>,
    %15 = tpu.transpose %12, [1, 0] : vector<128x1xf32> -> vector<1x128xf32>
    %c0_13 = arith.constant 0 : index
    %c0_14 = arith.constant 0 : index
    %16 = vector.load %arg7[%c0_13, %c0_14] : memref<1x128xf32, #tpu.memory_space<vmem>>, vector<1x128xf32>
    tpu.vector_store %arg7[%c0_13, %c0_14], %15 {strides = array<i32>} : memref<1x128xf32, #tpu.memory_space<vmem>>, vector<1x128xf32>,
    return
  }
  func.func @transform_0(%arg0: i32) -> (i32, i32) {
    %c0_i32 = arith.constant 0 : i32
    %c0_i32_0 = arith.constant 0 : i32
    return %arg0, %c0_i32 : i32, i32
  }
  func.func @transform_1(%arg0: i32) -> (i32, i32) {
    %c0_i32 = arith.constant 0 : i32
    %c0_i32_0 = arith.constant 0 : i32
    %c0_i32_1 = arith.constant 0 : i32
    return %c0_i32, %c0_i32_0 : i32, i32
  }
  func.func @transform_2(%arg0: i32) -> (i32, i32) {
    %c0_i32 = arith.constant 0 : i32
    %c0_i32_0 = arith.constant 0 : i32
    %c0_i32_1 = arith.constant 0 : i32
    return %c0_i32, %c0_i32_0 : i32, i32
  }
  func.func @transform_3(%arg0: i32) -> (i32, i32) {
    %c0_i32 = arith.constant 0 : i32
    %c0_i32_0 = arith.constant 0 : i32
    %c0_i32_1 = arith.constant 0 : i32
    return %c0_i32, %c0_i32_0 : i32, i32
  }
  func.func @transform_4(%arg0: i32) -> (i32, i32) {
    %c0_i32 = arith.constant 0 : i32
    %c0_i32_0 = arith.constant 0 : i32
    return %arg0, %c0_i32 : i32, i32
  }
  func.func @transform_5(%arg0: i32) -> (i32, i32) {
    %c0_i32 = arith.constant 0 : i32
    %c0_i32_0 = arith.constant 0 : i32
    return %arg0, %c0_i32 : i32, i32
  }
  func.func @transform_6(%arg0: i32) -> (i32, i32) {
    %c0_i32 = arith.constant 0 : i32
    %c0_i32_0 = arith.constant 0 : i32
    return %c0_i32, %arg0 : i32, i32
  }
}

</mosaic_0001>

<bundles_post_ra>
// kernel: tpu_custom_call.1
= control target key start
LH: loop header
LB: loop body
LE: loop exit
PB: predicated region body
PF: predicated region fallthrough
CT: control target
= control target key end

     0   :  { %12 = vsyncpa [#allocation3], 0  ;;  %vm40_vm0 = vcmask 130048   ;;  %s671_s0 = inlined_call_operand.vmem [shape: f32[128,16], index: 0, kind: input, shape index: {}]   ;;  %s672_s1 = inlined_call_operand.vmem [shape: f32[16,128], index: 1, kind: input, shape index: {}]   ;;  %s673_s2 = inlined_call_operand.vmem [shape: f32[1,128], index: 2, kind: input, shape index: {}]   ;;  %s674_s3 = inlined_call_operand.vmem [shape: f32[1,128], index: 3, kind: input, shape index: {}]   ;;  %s675_s4 = inlined_call_operand.hbm [shape: f32[128,128], index: 4, kind: output, shape index: {0}]   ;;  %s676_s5 = inlined_call_operand.vmem [shape: f32[128,1], index: 5, kind: output, shape index: {1}]   ;;  %s677_s6 = inlined_call_operand.hbm [shape: f32[1,128], index: 6, kind: output, shape index: {2}]  }
   0x1   :  { %v39_v0 = vld [vmem:[%s672_s1 + $0x8] sm:$0xff]  ;;  %v38_v1 = vld [vmem:[%s672_s1] sm:$0xff] }
   0x2   :  { %103 = vmatpush.msra.mxu0 %v39_v0  ;;  %378 = vmatpush.msra.mxu1 %v39_v0  ;;  %v22_v2 = vld [vmem:[%s671_s0] sm:$0xff] }
   0x3   :  { %380 = vmatpush.msra.mxu3 %v39_v0  ;;  %379 = vmatpush.msra.mxu2 %v39_v0  ;;  %v26_v3 = vld [vmem:[%s671_s0 + $0x20] sm:$0xff] }
   0x4   :  { %v34_v4 = vld [vmem:[%s671_s0 + $0x60] sm:$0xff]  ;;  %104 = vmatpush.msra.mxu0 %v38_v1  ;;  %381 = vmatpush.msra.mxu1 %v38_v1 }
   0x5   :  { %383 = vmatpush.msra.mxu3 %v38_v1  ;;  %362 = vmatmul.msk.f32.vlgmr.msra.gmra.mxu0 %vm40_vm0, %v22_v2  ;;  %v30_v5 = vld [vmem:[%s671_s0 + $0x40] sm:$0xff] }
   0x6   :  { %366 = vmatmul.msk.f32.vlgmr.msra.gmra.mxu1 %vm40_vm0, %v26_v3  ;;  %374 = vmatmul.msk.f32.vlgmr.msra.gmra.mxu3 %vm40_vm0, %v34_v4 }
   0x7   :  { %382 = vmatpush.msra.mxu2 %v38_v1 }
   0x8   :  { %13 = vsyncpa [#allocation5], 0  ;;  %370 = vmatmul.msk.f32.vlgmr.msra.gmra.mxu2 %vm40_vm0, %v30_v5  ;;  %v23_v6 = vld [vmem:[%s671_s0 + $0x8] sm:$0xff]  ;;  %v24_v10 = vld [vmem:[%s671_s0 + $0x10] sm:$0xff]  ;;  %vm274_vm1 = vcmask 7168   ;;  %s330_s12 = sshll.u32 %s675_s4, 4  ;;  %s331_s12 = int_to_ptr.hbm [resolvable:$true] %s330_s12 }
   0x9   :  { %v35_v7 = vld [vmem:[%s671_s0 + $0x68] sm:$0xff]  ;;  %v36_v11 = vld [vmem:[%s671_s0 + $0x70] sm:$0xff]  ;;  %v25_v14 = vld [vmem:[%s671_s0 + $0x18] sm:$0xff]  ;;  %s443_s13 = smov 128   ;;  %s444_s14 = smov 8  }
   0xa   :  { %v27_v8 = vld [vmem:[%s671_s0 + $0x28] sm:$0xff]  ;;  %v28_v12 = vld [vmem:[%s671_s0 + $0x30] sm:$0xff]  ;;  %v29_v15 = vld [vmem:[%s671_s0 + $0x38] sm:$0xff]  ;;  %s445_s4 = smov [#allocation4]   ;;  %s346_s21 = sshll.u32 %s677_s6, 4  ;;  %s347_s21 = int_to_ptr.hbm [resolvable:$true] %s346_s21 }
   0xb   :  { %v31_v9 = vld [vmem:[%s671_s0 + $0x48] sm:$0xff]  ;;  %v32_v13 = vld [vmem:[%s671_s0 + $0x50] sm:$0xff]  ;;  %v37_v16 = vld [vmem:[%s671_s0 + $0x78] sm:$0xff] }
   0xc   :  { %v33_v17 = vld [vmem:[%s671_s0 + $0x58] sm:$0xff]  ;;  %v554_v18 = vld [vmem:[%s673_s2] ss:$0 sm:$0xff]  ;;  %s442_s0 = smov [#allocation2]  }
   0xd   :  { %363 = vmatmul.msk.f32.gmra.mxu0 %vm40_vm0, %v23_v6  ;;  %v559_v19 = vld [vmem:[%s674_s3] ss:$0 sm:$0xff]  ;;  %s328_s2 = sshll.u32 %s442_s0, 4  ;;  %s329_s2 = int_to_ptr.vmem [resolvable:$true] %s328_s2 }
   0xe   :  { %375 = vmatmul.msk.f32.gmra.mxu3 %vm40_vm0, %v35_v7  ;;  %367 = vmatmul.msk.f32.gmra.mxu1 %vm40_vm0, %v27_v8 }
  0x10   :  { %371 = vmatmul.msk.f32.gmra.mxu2 %vm40_vm0, %v31_v9 }
  0x15   :  { %364 = vmatmul.msk.f32.gmra.mxu0 %vm40_vm0, %v24_v10 }
  0x16   :  { %376 = vmatmul.msk.f32.gmra.mxu3 %vm40_vm0, %v36_v11  ;;  %368 = vmatmul.msk.f32.gmra.mxu1 %vm40_vm0, %v28_v12 }
  0x18   :  { %372 = vmatmul.msk.f32.gmra.mxu2 %vm40_vm0, %v32_v13 }
  0x1d   :  { %365 = vmatmul.msk.f32.gmra.mxu0 %vm40_vm0, %v25_v14 }
  0x1e   :  { %369 = vmatmul.msk.f32.gmra.mxu1 %vm40_vm0, %v29_v15  ;;  %377 = vmatmul.msk.f32.gmra.mxu3 %vm40_vm0, %v37_v16 }
  0x20   :  { %373 = vmatmul.msk.f32.gmra.mxu2 %vm40_vm0, %v33_v17 }
  0x82   :  { %v106_v20 = vpop.f32.mrf.mxu0 }
  0x83   :  { %258 = vst [vmem:[#allocation2] sm:$0xff] %v106_v20  ;;  %v118_v21 = vpop.f32.mrf.mxu1  ;;  %v158_v22 = vmul.f32 %v554_v18, %v106_v20  ;;  %v210_v23 = vmul.f32 %v559_v19, %v106_v20 }
  0x84   :  { %262 = vst [vmem:[#allocation2 + $0x20] sm:$0xff] %v118_v21  ;;  %v162_v24 = vmul.f32 %v554_v18, %v118_v21  ;;  %v214_v53 = vmul.f32 %v559_v19, %v118_v21 }
  0x85   :  { %174 = vadd.xlane.f32.xlu0 %v158_v22  ;;  %226 = vadd.xlane.f32.xlu1 %v210_v23 }
  0x86   :  { %182 = vadd.xlane.f32.xlu2 %v162_v24 }
  0x89   :  { %v142_v25 = vpop.f32.mrf.mxu3 }
  0x8a   :  { %270 = vst [vmem:[#allocation2 + $0x60] sm:$0xff] %v142_v25  ;;  %v109_v26 = vpop.f32.mrf.mxu0  ;;  %v565_v27 = vmul.f32 %v559_v19, %v142_v25  ;;  %v170_v29 = vmul.f32 %v554_v18, %v142_v25 }
  0x8b   :  { %v130_v28 = vpop.f32.mrf.mxu2  ;;  %259 = vst [vmem:[#allocation2 + $0x8] sm:$0xff] %v109_v26  ;;  %v121_v30 = vpop.f32.mrf.mxu1  ;;  %v159_v36 = vmul.f32 %v554_v18, %v109_v26  ;;  %v211_v45 = vmul.f32 %v559_v19, %v109_v26 }
  0x8c   :  { %266 = vst [vmem:[#allocation2 + $0x40] sm:$0xff] %v130_v28  ;;  %v166_v31 = vmul.f32 %v554_v18, %v130_v28  ;;  %v163_v34 = vmul.f32 %v554_v18, %v121_v30  ;;  %v215_v55 = vmul.f32 %v559_v19, %v121_v30  ;;  %v218_v58 = vmul.f32 %v559_v19, %v130_v28 }
  0x8d   :  { %198 = vadd.xlane.f32.xlu0 %v170_v29  ;;  %263 = vst [vmem:[#allocation2 + $0x28] sm:$0xff] %v121_v30 }
  0x8e   :  { %190 = vadd.xlane.f32.xlu2 %v166_v31 }
  0x91   :  { %v569_v32 = vpop.f32.mrf.mxu3 }
  0x92   :  { %271 = vst [vmem:[#allocation2 + $0x68] sm:$0xff] %v569_v32  ;;  %v171_v33 = vmul.f32 %v554_v18, %v569_v32  ;;  %v112_v35 = vpop.f32.mrf.mxu0  ;;  %v223_v1 = vmul.f32 %v559_v19, %v569_v32 }
  0x93   :  { %260 = vst [vmem:[#allocation2 + $0x10] sm:$0xff] %v112_v35  ;;  %v133_v37 = vpop.f32.mrf.mxu2  ;;  %v124_v38 = vpop.f32.mrf.mxu1  ;;  %v160_v39 = vmul.f32 %v554_v18, %v112_v35  ;;  %v212_v52 = vmul.f32 %v559_v19, %v112_v35 }
  0x94   :  { %200 = vadd.xlane.f32.xlu1 %v171_v33  ;;  %267 = vst [vmem:[#allocation2 + $0x48] sm:$0xff] %v133_v37  ;;  %v167_v42 = vmul.f32 %v554_v18, %v133_v37  ;;  %v164_v47 = vmul.f32 %v554_v18, %v124_v38  ;;  %v216_v61 = vmul.f32 %v559_v19, %v124_v38 }
  0x95   :  { %176 = vadd.xlane.f32.xlu0 %v159_v36  ;;  %264 = vst [vmem:[#allocation2 + $0x30] sm:$0xff] %v124_v38  ;;  %v219_v0 = vmul.f32 %v559_v19, %v133_v37 }
  0x96   :  { %184 = vadd.xlane.f32.xlu2 %v163_v34 }
  0x99   :  { %v148_v40 = vpop.f32.mrf.mxu3 }
  0x9a   :  { %272 = vst [vmem:[#allocation2 + $0x70] sm:$0xff] %v148_v40  ;;  %v115_v41 = vpop.f32.mrf.mxu0  ;;  %v172_v49 = vmul.f32 %v554_v18, %v148_v40  ;;  %v224_v2 = vmul.f32 %v559_v19, %v148_v40 }
  0x9b   :  { %v136_v43 = vpop.f32.mrf.mxu2  ;;  %261 = vst [vmem:[#allocation2 + $0x18] sm:$0xff] %v115_v41  ;;  %v127_v44 = vpop.f32.mrf.mxu1  ;;  %v161_v51 = vmul.f32 %v554_v18, %v115_v41  ;;  %v213_v57 = vmul.f32 %v559_v19, %v115_v41 }
  0x9c   :  { %178 = vadd.xlane.f32.xlu1 %v160_v39  ;;  %268 = vst [vmem:[#allocation2 + $0x50] sm:$0xff] %v136_v43  ;;  %v168_v46 = vmul.f32 %v554_v18, %v136_v43  ;;  %v165_v54 = vmul.f32 %v554_v18, %v127_v44  ;;  %v220_v56 = vmul.f32 %v559_v19, %v136_v43 }
  0x9d   :  { %192 = vadd.xlane.f32.xlu0 %v167_v42  ;;  %265 = vst [vmem:[#allocation2 + $0x38] sm:$0xff] %v127_v44  ;;  %v217_v59 = vmul.f32 %v559_v19, %v127_v44 }
  0x9e   :  { %228 = vadd.xlane.f32.xlu2 %v211_v45 }
  0xa1   :  { %v151_v48 = vpop.f32.mrf.mxu3 }
  0xa2   :  { %273 = vst [vmem:[#allocation2 + $0x78] sm:$0xff] %v151_v48  ;;  %v173_v60 = vmul.f32 %v554_v18, %v151_v48  ;;  %v225_v3 = vmul.f32 %v559_v19, %v151_v48 }
  0xa3   :  { %v139_v50 = vpop.f32.mrf.mxu2 }
  0xa4   :  { %194 = vadd.xlane.f32.xlu1 %v168_v46  ;;  %269 = vst [vmem:[#allocation2 + $0x58] sm:$0xff] %v139_v50  ;;  %v169_v62 = vmul.f32 %v554_v18, %v139_v50  ;;  %v221_v63 = vmul.f32 %v559_v19, %v139_v50 }
  0xa5   :  { %186 = vadd.xlane.f32.xlu0 %v164_v47  ;;  %336 = dma.vmem_to_hbm [thread:$0]  %s329_s2, 2048, %s331_s12, [#allocation3], %s443_s13, %s443_s13, %s444_s14  }
  0xa6   :  { %202 = vadd.xlane.f32.xlu2 %v172_v49 }
  0xac   :  { %180 = vadd.xlane.f32.xlu1 %v161_v51 }
  0xad   :  { %230 = vadd.xlane.f32.xlu0 %v212_v52 }
  0xae   :  { %234 = vadd.xlane.f32.xlu2 %v214_v53 }
  0xb4   :  { %188 = vadd.xlane.f32.xlu1 %v165_v54 }
  0xb5   :  { %236 = vadd.xlane.f32.xlu0 %v215_v55 }
  0xb6   :  { %246 = vadd.xlane.f32.xlu2 %v220_v56 }
  0xbc   :  { %232 = vadd.xlane.f32.xlu1 %v213_v57 }
  0xbd   :  { %242 = vadd.xlane.f32.xlu0 %v218_v58 }
  0xbe   :  { %240 = vadd.xlane.f32.xlu2 %v217_v59 }
  0xc4   :  { %238 = vadd.xlane.f32.xlu1 %v216_v61 }
  0xc5   :  { %204 = vadd.xlane.f32.xlu0 %v173_v60 }
  0xc6   :  { %196 = vadd.xlane.f32.xlu2 %v169_v62 }
  0xcc   :  { %244 = vadd.xlane.f32.xlu1 %v219_v0 }
  0xcd   :  { %248 = vadd.xlane.f32.xlu0 %v221_v63 }
  0xce   :  { %252 = vadd.xlane.f32.xlu2 %v223_v1 }
  0xd4   :  { %250 = vadd.xlane.f32.xlu1 %v565_v27 }
  0xd5   :  { %254 = vadd.xlane.f32.xlu0 %v224_v2 }
  0xdc   :  { %256 = vadd.xlane.f32.xlu1 %v225_v3 }
  0xf8   :  { %v175_v4 = vpop.xlane.xlu0 %174  ;;  %v227_v5 = vpop.xlane.xlu1 %226 }
  0xf9   :  { %v183_v6 = vpop.xlane.xlu2 %182  ;;  %275 = vst.msk [vmem:[%s676_s5] sm:$0xff] %vm274_vm1, %v175_v4  ;;  %291 = vxpose.xlu2.b32.start [1/16] (narrow) %v227_v5, 8 }
  0xfa   :  { %279 = vst.msk [vmem:[%s676_s5 + $0x20] sm:$0xff] %vm274_vm1, %v183_v6 }
 0x100   :  { %v199_v7 = vpop.xlane.xlu0 %198 }
 0x101   :  { %v191_v8 = vpop.xlane.xlu2 %190  ;;  %287 = vst.msk [vmem:[%s676_s5 + $0x60] sm:$0xff] %vm274_vm1, %v199_v7 }
 0x102   :  { %283 = vst.msk [vmem:[%s676_s5 + $0x40] sm:$0xff] %vm274_vm1, %v191_v8 }
 0x107   :  { %v201_v9 = vpop.xlane.xlu1 %200 }
 0x108   :  { %288 = vst.msk [vmem:[%s676_s5 + $0x68] sm:$0xff] %vm274_vm1, %v201_v9  ;;  %v177_v10 = vpop.xlane.xlu0 %176 }
 0x109   :  { %v185_v11 = vpop.xlane.xlu2 %184  ;;  %276 = vst.msk [vmem:[%s676_s5 + $0x8] sm:$0xff] %vm274_vm1, %v177_v10 }
 0x10a   :  { %280 = vst.msk [vmem:[%s676_s5 + $0x28] sm:$0xff] %vm274_vm1, %v185_v11 }
 0x10f   :  { %v179_v12 = vpop.xlane.xlu1 %178 }
 0x110   :  { %277 = vst.msk [vmem:[%s676_s5 + $0x10] sm:$0xff] %vm274_vm1, %v179_v12  ;;  %v193_v13 = vpop.xlane.xlu0 %192 }
 0x111   :  { %v229_v14 = vpop.xlane.xlu2 %228  ;;  %284 = vst.msk [vmem:[%s676_s5 + $0x48] sm:$0xff] %vm274_vm1, %v193_v13 }
 0x112   :  { %292 = vxpose.xlu2.b32.cont [2/16] (narrow) %v229_v14, 8 }
 0x117   :  { %v195_v15 = vpop.xlane.xlu1 %194 }
 0x118   :  { %285 = vst.msk [vmem:[%s676_s5 + $0x50] sm:$0xff] %vm274_vm1, %v195_v15  ;;  %v187_v16 = vpop.xlane.xlu0 %186 }
 0x119   :  { %v203_v17 = vpop.xlane.xlu2 %202  ;;  %281 = vst.msk [vmem:[%s676_s5 + $0x30] sm:$0xff] %vm274_vm1, %v187_v16 }
 0x11a   :  { %289 = vst.msk [vmem:[%s676_s5 + $0x70] sm:$0xff] %vm274_vm1, %v203_v17 }
 0x11f   :  { %v181_v18 = vpop.xlane.xlu1 %180 }
 0x120   :  { %278 = vst.msk [vmem:[%s676_s5 + $0x18] sm:$0xff] %vm274_vm1, %v181_v18  ;;  %v231_v19 = vpop.xlane.xlu0 %230 }
 0x121   :  { %v235_v20 = vpop.xlane.xlu2 %234  ;;  %293 = vxpose.xlu2.b32.cont [3/16] (narrow) %v231_v19, 8 }
 0x127   :  { %v189_v21 = vpop.xlane.xlu1 %188 }
 0x128   :  { %282 = vst.msk [vmem:[%s676_s5 + $0x38] sm:$0xff] %vm274_vm1, %v189_v21  ;;  %v237_v22 = vpop.xlane.xlu0 %236 }
 0x129   :  { %v247_v23 = vpop.xlane.xlu2 %246 }
 0x12f   :  { %v233_v24 = vpop.xlane.xlu1 %232 }
 0x130   :  { %294 = vxpose.xlu2.b32.cont [4/16] (narrow) %v233_v24, 8  ;;  %v243_v25 = vpop.xlane.xlu0 %242 }
 0x131   :  { %v241_v26 = vpop.xlane.xlu2 %240 }
 0x137   :  { %v239_v29 = vpop.xlane.xlu1 %238 }
 0x138   :  { %295 = vxpose.xlu2.b32.cont [5/16] (narrow) %v235_v20, 8  ;;  %v205_v27 = vpop.xlane.xlu0 %204 }
 0x139   :  { %v197_v28 = vpop.xlane.xlu2 %196  ;;  %290 = vst.msk [vmem:[%s676_s5 + $0x78] sm:$0xff] %vm274_vm1, %v205_v27 }
 0x13a   :  { %286 = vst.msk [vmem:[%s676_s5 + $0x58] sm:$0xff] %vm274_vm1, %v197_v28  ;;  %s344_s5 = sshll.u32 %s445_s4, 4  ;;  %s345_s5 = int_to_ptr.vmem [resolvable:$true] %s344_s5 }
 0x13f   :  { %v245_v30 = vpop.xlane.xlu1 %244 }
 0x140   :  { %296 = vxpose.xlu2.b32.cont [6/16] (narrow) %v237_v22, 8  ;;  %v249_v31 = vpop.xlane.xlu0 %248 }
 0x141   :  { %v253_v33 = vpop.xlane.xlu2 %252 }
 0x147   :  { %v251_v32 = vpop.xlane.xlu1 %250 }
 0x148   :  { %297 = vxpose.xlu2.b32.cont [7/16] (narrow) %v239_v29, 8  ;;  %v255_v34 = vpop.xlane.xlu0 %254 }
 0x14f   :  { %v257_v35 = vpop.xlane.xlu1 %256 }
 0x150   :  { %298 = vxpose.xlu2.b32.cont [8/16] (narrow) %v241_v26, 8 }
 0x158   :  { %299 = vxpose.xlu2.b32.cont [9/16] (narrow) %v243_v25, 8 }
 0x160   :  { %300 = vxpose.xlu2.b32.cont [10/16] (narrow) %v245_v30, 8 }
 0x168   :  { %301 = vxpose.xlu2.b32.cont [11/16] (narrow) %v247_v23, 8 }
 0x170   :  { %302 = vxpose.xlu2.b32.cont [12/16] (narrow) %v249_v31, 8 }
 0x178   :  { %303 = vxpose.xlu2.b32.cont [13/16] (narrow) %v251_v32, 8 }
 0x180   :  { %304 = vxpose.xlu2.b32.cont [14/16] (narrow) %v253_v33, 8 }
 0x188   :  { %305 = vxpose.xlu2.b32.cont [15/16] (narrow) %v255_v34, 8 }
 0x190   :  { %306 = vxpose.xlu2.b32.end [16/16] (narrow) %v257_v35, 8 }
 0x1b1   :  { %v307_v36 = vpop.trf.xlu2 }
 0x1b2   :  { %323 = vst [vmem:[#allocation4] sm:$0x1] %v307_v36 }
 0x1b3   :  { %349 = dma.vmem_to_hbm [thread:$0]  %s345_s5, 16, %s347_s21, [#allocation5]  }
 0x1b4   :  { %438 = dma.done.wait [#allocation3], 2048  }
 0x1b5   :  { %439 = vsyncadd [#allocation3], 4294965248 }
 0x1b6   :  { %440 = dma.done.wait [#allocation5], 16  }
 0x1b7   :  { %441 = vsyncadd [#allocation5], 4294967280 }
 0x1b8   :  { %360 = vsyncpa [#allocation3], 1 }
 0x1b9   :  { %361 = vsyncpa [#allocation5], 1 }

</bundles_post_ra>
